<compile_context>
chip_gen: v6e
topology: v6e:2x2x1
jax: 0.10.0
libtpu: 0.0.40
codegen_flags: <defaults>
</compile_context>

<pallas_src>
import jax
import jax.numpy as jnp
from jax.experimental import pallas as pl
from jax.experimental.pallas import tpu as pltpu

LANE = 128                 # TPU lane width (last dim)
SUBLANE = 8                # f32 sublane granularity (second-last dim)
MAX_TILE = 8192            # batch rows/lanes per grid step (~20 MB VMEM worst case)
LANES_LAYOUT_MIN_B = 1024  # switch to batch-in-lanes dataflow above this batch


def _round_up(x, m):
    return (x + m - 1) // m * m


def _cdiv(a, b):
    return -(-a // b)


def _num_tensorcores():
    """#TensorCores dimension_semantics=("parallel",) can shard across.

    v7x has 2 TCs per chip; v5e / v6e have 1.  Unknown -> 1 (still correct)."""
    try:
        kind = jax.devices()[0].device_kind.lower()
    except Exception:
        return 1
    return 2 if ("v7" in kind or "7x" in kind) else 1


def _tiles(batch, n_cores, align):
    """Derive (tile, n_tiles, padded_batch) from B instead of padding B up to a
    fixed tile: n_tiles is the #TensorCores (or more only if a tile would
    exceed MAX_TILE), so padding is at most n_tiles*align-1 rows."""
    n_tiles = max(n_cores, _round_up(_cdiv(batch, MAX_TILE), n_cores))
    tb = _round_up(_cdiv(batch, n_tiles), align)
    return tb, n_tiles, tb * n_tiles


# ---------------------------------------------------------------------------
# Kernel A ("rows"): batch in sublanes, lane-dense (TB, 128) output slab.
# ---------------------------------------------------------------------------
def a2c_mlp_rows_kernel(x_ref, w0_ref, b0_ref, w1_ref, b1_ref, wh_ref, bh_ref,
                        out_ref):
    x = x_ref[...]                                                  # (TB, d_in)

    h0 = jnp.dot(x, w0_ref[...], preferred_element_type=jnp.float32) + b0_ref[...]
    h0 = jnp.maximum(h0, 0.0)                                       # (TB, 128)

    feat = jnp.dot(h0, w1_ref[...], preferred_element_type=jnp.float32) + b1_ref[...]
    feat = jnp.maximum(feat, 0.0)                                   # (TB, 128)

    # fused actor+critic head: cols [0:P]=score, col [P]=value, rest = 0.
    out_ref[...] = (jnp.dot(feat, wh_ref[...],
                            preferred_element_type=jnp.float32) + bh_ref[...])


# ---------------------------------------------------------------------------
# Kernel B ("lanes"): batch in lanes (transposed), (8, TB) output slab.
# ---------------------------------------------------------------------------
def a2c_mlp_lanes_kernel(xt_ref, w0t_ref, b0t_ref, w1t_ref, b1t_ref,
                         wht_ref, bht_ref, out_ref):
    xt = xt_ref[...]                                                # (d_in, TB)

    h0 = jnp.dot(w0t_ref[...], xt, preferred_element_type=jnp.float32) + b0t_ref[...]
    h0 = jnp.maximum(h0, 0.0)                                       # (128, TB)

    feat = jnp.dot(w1t_ref[...], h0, preferred_element_type=jnp.float32) + b1t_ref[...]
    feat = jnp.maximum(feat, 0.0)                                   # (128, TB)

    # fused actor+critic head: rows [0:P]=score, row [P]=value, rest = 0.
    out_ref[...] = (jnp.dot(wht_ref[...], feat,
                            preferred_element_type=jnp.float32) + bht_ref[...])


# ---------------------------------------------------------------------------
# Wrapper: generation-aware tiling + layout selection + head de-fusion.
# ---------------------------------------------------------------------------
def a2c_forward(x, packed_params, *, num_products, layout="auto"):
    """Fused A2C forward.  x: (B, d_in) float32.  Returns (score, value)."""
    B, d_in = x.shape
    n_cores = _num_tensorcores()
    if layout == "auto":
        layout = "lanes" if B >= LANES_LAYOUT_MIN_B else "rows"

    compiler_params = pltpu.CompilerParams(
        dimension_semantics=("parallel",),        # shard tiles across v7x TCs
        vmem_limit_bytes=32 * 1024 * 1024,        # safe on v5e/v6e/v7x
    )
    full = lambda i: (0, 0)   # weights/biases: whole-array, VMEM-resident

    if layout == "rows":
        (w0p, b0p, w1p, b1p, whp, bhp) = packed_params["rows"]
        head_p = whp.shape[1]                     # 128 (lane-dense fused head)
        tb, n_tiles, b_pad = _tiles(B, n_cores, SUBLANE)
        x_in = jnp.pad(x, ((0, b_pad - B), (0, 0))) if b_pad != B else x

        out = pl.pallas_call(
            a2c_mlp_rows_kernel,
            out_shape=jax.ShapeDtypeStruct((b_pad, head_p), jnp.float32),
            grid=(n_tiles,),
            in_specs=[
                pl.BlockSpec((tb, d_in), lambda i: (i, 0)),  # x tiles
                pl.BlockSpec(w0p.shape, full),
                pl.BlockSpec(b0p.shape, full),
                pl.BlockSpec(w1p.shape, full),
                pl.BlockSpec(b1p.shape, full),
                pl.BlockSpec(whp.shape, full),
                pl.BlockSpec(bhp.shape, full),
            ],
            out_specs=pl.BlockSpec((tb, head_p), lambda i: (i, 0)),
            compiler_params=compiler_params,
        )(x_in, w0p, b0p, w1p, b1p, whp, bhp)

        score = out[:B, :num_products]
        value = out[:B, num_products:num_products + 1]
        return score, value

    # ---- "lanes": batch-in-lanes transposed dataflow (large B) ----
    (w0t, b0t, w1t, b1t, wht, bht) = packed_params["lanes"]
    head_s = wht.shape[0]                         # 8 sublanes (fused head)
    tb, n_tiles, b_pad = _tiles(B, n_cores, LANE)
    xt = x.T                                      # layout plumbing in wrapper
    if b_pad != B:
        xt = jnp.pad(xt, ((0, 0), (0, b_pad - B)))

    out = pl.pallas_call(
        a2c_mlp_lanes_kernel,
        out_shape=jax.ShapeDtypeStruct((head_s, b_pad), jnp.float32),
        grid=(n_tiles,),
        in_specs=[
            pl.BlockSpec((d_in, tb), lambda i: (0, i)),      # x^T tiles
            pl.BlockSpec(w0t.shape, full),
            pl.BlockSpec(b0t.shape, full),
            pl.BlockSpec(w1t.shape, full),
            pl.BlockSpec(b1t.shape, full),
            pl.BlockSpec(wht.shape, full),
            pl.BlockSpec(bht.shape, full),
        ],
        out_specs=pl.BlockSpec((head_s, tb), lambda i: (0, i)),
        compiler_params=compiler_params,
    )(xt, w0t, b0t, w1t, b1t, wht, bht)

    score = out[:num_products, :B].T
    value = out[num_products:num_products + 1, :B].T
    return score, value


# ---------------------------------------------------------------------------
# Parameter construction (PyTorch Linear-style init) + one-time packing.
# ---------------------------------------------------------------------------
def init_linear(key, fan_in, fan_out):
    kw, kb = jax.random.split(key)
    bound = 1.0 / jnp.sqrt(jnp.float32(fan_in))
    # Stored as (in, out) so the reference computes x @ W + b.
    w = jax.random.uniform(kw, (fan_in, fan_out), jnp.float32, -bound, bound)
    b = jax.random.uniform(kb, (fan_out,), jnp.float32, -bound, bound)
    return w, b


def make_params(key, d_in, w0_dim, nn_out, num_products):
    """Un-padded, PyTorch-equivalent Linear params (used by the reference)."""
    k0, k1, ka, kc = jax.random.split(key, 4)
    w0, b0 = init_linear(k0, d_in, w0_dim)           # share[0]
    w1, b1 = init_linear(k1, w0_dim, nn_out)         # share[2]
    wa, ba = init_linear(ka, nn_out, num_products)   # actor head
    wc, bc = init_linear(kc, nn_out, 1)              # critic head
    return (w0, b0, w1, b1, wa, ba, wc, bc)


def pack_params(raw):
    """Fuse actor+critic heads and zero-pad every operand to (8,128)-aligned
    shapes, in BOTH dataflow orientations (done once at init time)."""
    (w0, b0, w1, b1, wa, ba, wc, bc) = raw
    d_in = w0.shape[0]
    w0_dim = w0.shape[1]
    nn_out = w1.shape[1]
    num_products = wa.shape[1]

    h0_p = _round_up(w0_dim, LANE)                    # 32 -> 128
    h1_p = _round_up(nn_out, LANE)                    # 32 -> 128
    head_p = _round_up(num_products + 1, LANE)        # 5  -> 128 (rows layout)
    head_s = _round_up(num_products + 1, SUBLANE)     # 5  -> 8   (lanes layout)

    def pad2(a, rows, cols):
        return jnp.pad(a, ((0, rows - a.shape[0]), (0, cols - a.shape[1])))

    wh = jnp.concatenate([wa, wc], axis=1)            # (nn_out, P+1)
    bh = jnp.concatenate([ba, bc], axis=0)            # (P+1,)

    rows = (
        pad2(w0, d_in, h0_p),
        pad2(b0.reshape(1, -1), 1, h0_p),
        pad2(w1, h0_p, h1_p),
        pad2(b1.reshape(1, -1), 1, h1_p),
        pad2(wh, h1_p, head_p),
        pad2(bh.reshape(1, -1), 1, head_p),
    )
    lanes = (
        pad2(w0.T, h0_p, d_in),
        pad2(b0.reshape(-1, 1), h0_p, 1),
        pad2(w1.T, h1_p, h0_p),
        pad2(b1.reshape(-1, 1), h1_p, 1),
        pad2(wh.T, head_s, h1_p),
        pad2(bh.reshape(-1, 1), head_s, 1),
    )
    return {"rows": rows, "lanes": lanes}


def reference_forward(x, raw):
    (w0, b0, w1, b1, wa, ba, wc, bc) = raw
    h = jnp.maximum(x @ w0 + b0, 0.0)
    feat = jnp.maximum(h @ w1 + b1, 0.0)
    return feat @ wa + ba, feat @ wc + bc


if __name__ == "__main__":
    # Small, consistent config (args.h == 1, MLP == True):
    num_products = 4
    cus_embedding_dim = 4
    t_embedding_dim = 4
    d_in = num_products + cus_embedding_dim + t_embedding_dim   # 12
    w0_dim = 32            # args.w[0]
    nn_out = 32            # args.nn_out
    batch = 2

    key = jax.random.PRNGKey(0)
    kx, kp = jax.random.split(key)

    # Input is what roll_out builds: [inventory ratios | t_embedding | cus_embedding]
    x = jax.random.uniform(kx, (batch, d_in), jnp.float32)
    raw_params = make_params(kp, d_in, w0_dim, nn_out, num_products)
    packed_params = pack_params(raw_params)

    # 1) rollout-sized batch (rows layout, single grid step).
    score, value = a2c_forward(x, packed_params, num_products=num_products)
    jax.block_until_ready((score, value))
    ref_score, ref_value = reference_forward(x, raw_params)
    assert score.shape == (batch, num_products)
    assert value.shape == (batch, 1)
    assert jnp.allclose(score, ref_score, atol=1e-5, rtol=1e-5)
    assert jnp.allclose(value, ref_value, atol=1e-5, rtol=1e-5)

    # 2) awkward mid-size batch (rows layout; exercises B-derived tiling with
    #    no round-up-to-fixed-tile padding waste).
    xm = jax.random.uniform(jax.random.PRNGKey(1), (520, d_in), jnp.float32)
    sm, vm = a2c_forward(xm, packed_params, num_products=num_products)
    jax.block_until_ready((sm, vm))
    rsm, rvm = reference_forward(xm, raw_params)
    assert jnp.allclose(sm, rsm, atol=1e-4, rtol=1e-4)
    assert jnp.allclose(vm, rvm, atol=1e-4, rtol=1e-4)

    # 3) large batch (batch-in-lanes transposed layout).
    xb = jax.random.uniform(jax.random.PRNGKey(2), (2048, d_in), jnp.float32)
    sb, vb = a2c_forward(xb, packed_params, num_products=num_products)
    jax.block_until_ready((sb, vb))
    rsb, rvb = reference_forward(xb, raw_params)
    assert sb.shape == (2048, num_products) and vb.shape == (2048, 1)
    assert jnp.allclose(sb, rsb, atol=1e-4, rtol=1e-4)
    assert jnp.allclose(vb, rvb, atol=1e-4, rtol=1e-4)

    # TODO(synk): the non-MLP branch uses nn.RNN as the actor, and the
    # sampling / masking logic in _select_node_* plus the embedding lookups in
    # roll_out are env- and data-dependent host control flow, so only the core
    # forward() hot path (share MLP + fused actor/critic heads) is in the kernel.
    print("KERNEL_OK")
</pallas_src>

<mosaic_0001>
module attributes {stable_mosaic.version = 11 : i64} {
  func.func @a2c_mlp_rows_kernel(%arg0: i32, %arg1: memref<8x12xf32, #tpu.memory_space<vmem>>, %arg2: memref<12x128xf32, #tpu.memory_space<vmem>>, %arg3: memref<1x128xf32, #tpu.memory_space<vmem>>, %arg4: memref<128x128xf32, #tpu.memory_space<vmem>>, %arg5: memref<1x128xf32, #tpu.memory_space<vmem>>, %arg6: memref<128x128xf32, #tpu.memory_space<vmem>>, %arg7: memref<1x128xf32, #tpu.memory_space<vmem>>, %arg8: memref<8x128xf32, #tpu.memory_space<vmem>>) attributes {dimension_semantics = [#tpu.dimension_semantics<parallel>], iteration_bounds = array<i64: 1>, scalar_prefetch = 0 : i64, scratch_operands = 0 : i64, tpu.core_type = #tpu.core_type<tc>, window_params = [{transform_indices = @transform_0, window_bounds = array<i64: 8, 12>}, {pipeline_mode = #tpu.pipeline_mode<synchronous>, transform_indices = @transform_1, window_bounds = array<i64: 12, 128>}, {pipeline_mode = #tpu.pipeline_mode<synchronous>, transform_indices = @transform_2, window_bounds = array<i64: 1, 128>}, {pipeline_mode = #tpu.pipeline_mode<synchronous>, transform_indices = @transform_3, window_bounds = array<i64: 128, 128>}, {pipeline_mode = #tpu.pipeline_mode<synchronous>, transform_indices = @transform_4, window_bounds = array<i64: 1, 128>}, {pipeline_mode = #tpu.pipeline_mode<synchronous>, transform_indices = @transform_5, window_bounds = array<i64: 128, 128>}, {pipeline_mode = #tpu.pipeline_mode<synchronous>, transform_indices = @transform_6, window_bounds = array<i64: 1, 128>}, {transform_indices = @transform_7, window_bounds = array<i64: 8, 128>}]} {
    %c0 = arith.constant 0 : index
    %c0_0 = arith.constant 0 : index
    %0 = vector.load %arg1[%c0, %c0_0] : memref<8x12xf32, #tpu.memory_space<vmem>>, vector<8x12xf32>
    %c0_1 = arith.constant 0 : index
    %c0_2 = arith.constant 0 : index
    %1 = vector.load %arg2[%c0_1, %c0_2] : memref<12x128xf32, #tpu.memory_space<vmem>>, vector<12x128xf32>
    %cst = arith.constant dense<0.000000e+00> : vector<8x128xf32>
    %2 = tpu.matmul %0, %1, %cst {dimension_numbers = #tpu.dot_dimension_numbers<[1], [0], [0], [1], [0, 0, 1, 1], [], []>} : vector<8x12xf32>, vector<12x128xf32>, vector<8x128xf32> -> vector<8x128xf32>
    %c0_3 = arith.constant 0 : index
    %c0_4 = arith.constant 0 : index
    %3 = vector.load %arg3[%c0_3, %c0_4] : memref<1x128xf32, #tpu.memory_space<vmem>>, vector<1x128xf32>
    %4 = vector.broadcast %3 : vector<1x128xf32> to vector<8x128xf32>
    %5 = arith.addf %2, %4 : vector<8x128xf32>
    %cst_5 = arith.constant 0.000000e+00 : f32
    %6 = vector.broadcast %cst_5 : f32 to vector<8x128xf32>
    %7 = arith.maximumf %5, %6 : vector<8x128xf32>
    %c0_6 = arith.constant 0 : index
    %c0_7 = arith.constant 0 : index
    %8 = vector.load %arg4[%c0_6, %c0_7] : memref<128x128xf32, #tpu.memory_space<vmem>>, vector<128x128xf32>
    %cst_8 = arith.constant dense<0.000000e+00> : vector<8x128xf32>
    %9 = tpu.matmul %7, %8, %cst_8 {dimension_numbers = #tpu.dot_dimension_numbers<[1], [0], [0], [1], [0, 0, 1, 1], [], []>} : vector<8x128xf32>, vector<128x128xf32>, vector<8x128xf32> -> vector<8x128xf32>
    %c0_9 = arith.constant 0 : index
    %c0_10 = arith.constant 0 : index
    %10 = vector.load %arg5[%c0_9, %c0_10] : memref<1x128xf32, #tpu.memory_space<vmem>>, vector<1x128xf32>
    %11 = vector.broadcast %10 : vector<1x128xf32> to vector<8x128xf32>
    %12 = arith.addf %9, %11 : vector<8x128xf32>
    %cst_11 = arith.constant 0.000000e+00 : f32
    %13 = vector.broadcast %cst_11 : f32 to vector<8x128xf32>
    %14 = arith.maximumf %12, %13 : vector<8x128xf32>
    %c0_12 = arith.constant 0 : index
    %c0_13 = arith.constant 0 : index
    %15 = vector.load %arg6[%c0_12, %c0_13] : memref<128x128xf32, #tpu.memory_space<vmem>>, vector<128x128xf32>
    %cst_14 = arith.constant dense<0.000000e+00> : vector<8x128xf32>
    %16 = tpu.matmul %14, %15, %cst_14 {dimension_numbers = #tpu.dot_dimension_numbers<[1], [0], [0], [1], [0, 0, 1, 1], [], []>} : vector<8x128xf32>, vector<128x128xf32>, vector<8x128xf32> -> vector<8x128xf32>
    %c0_15 = arith.constant 0 : index
    %c0_16 = arith.constant 0 : index
    %17 = vector.load %arg7[%c0_15, %c0_16] : memref<1x128xf32, #tpu.memory_space<vmem>>, vector<1x128xf32>
    %18 = vector.broadcast %17 : vector<1x128xf32> to vector<8x128xf32>
    %19 = arith.addf %16, %18 : vector<8x128xf32>
    %c0_17 = arith.constant 0 : index
    %c0_18 = arith.constant 0 : index
    %20 = vector.load %arg8[%c0_17, %c0_18] : memref<8x128xf32, #tpu.memory_space<vmem>>, vector<8x128xf32>
    tpu.vector_store %arg8[%c0_17, %c0_18], %19 {strides = array<i32>} : memref<8x128xf32, #tpu.memory_space<vmem>>, vector<8x128xf32>,
    return
  }
  func.func @transform_0(%arg0: i32) -> (i32, i32) {
    %c0_i32 = arith.constant 0 : i32
    %c0_i32_0 = arith.constant 0 : i32
    return %arg0, %c0_i32 : i32, i32
  }
  func.func @transform_1(%arg0: i32) -> (i32, i32) {
    %c0_i32 = arith.constant 0 : i32
    %c0_i32_0 = arith.constant 0 : i32
    %c0_i32_1 = arith.constant 0 : i32
    return %c0_i32, %c0_i32_0 : i32, i32
  }
  func.func @transform_2(%arg0: i32) -> (i32, i32) {
    %c0_i32 = arith.constant 0 : i32
    %c0_i32_0 = arith.constant 0 : i32
    %c0_i32_1 = arith.constant 0 : i32
    return %c0_i32, %c0_i32_0 : i32, i32
  }
  func.func @transform_3(%arg0: i32) -> (i32, i32) {
    %c0_i32 = arith.constant 0 : i32
    %c0_i32_0 = arith.constant 0 : i32
    %c0_i32_1 = arith.constant 0 : i32
    return %c0_i32, %c0_i32_0 : i32, i32
  }
  func.func @transform_4(%arg0: i32) -> (i32, i32) {
    %c0_i32 = arith.constant 0 : i32
    %c0_i32_0 = arith.constant 0 : i32
    %c0_i32_1 = arith.constant 0 : i32
    return %c0_i32, %c0_i32_0 : i32, i32
  }
  func.func @transform_5(%arg0: i32) -> (i32, i32) {
    %c0_i32 = arith.constant 0 : i32
    %c0_i32_0 = arith.constant 0 : i32
    %c0_i32_1 = arith.constant 0 : i32
    return %c0_i32, %c0_i32_0 : i32, i32
  }
  func.func @transform_6(%arg0: i32) -> (i32, i32) {
    %c0_i32 = arith.constant 0 : i32
    %c0_i32_0 = arith.constant 0 : i32
    %c0_i32_1 = arith.constant 0 : i32
    return %c0_i32, %c0_i32_0 : i32, i32
  }
  func.func @transform_7(%arg0: i32) -> (i32, i32) {
    %c0_i32 = arith.constant 0 : i32
    %c0_i32_0 = arith.constant 0 : i32
    return %arg0, %c0_i32 : i32, i32
  }
}

</mosaic_0001>

<bundles_post_ra>
// kernel: tpu_custom_call.1
= control target key start
LH: loop header
LB: loop body
LE: loop exit
PB: predicated region body
PF: predicated region fallthrough
CT: control target
= control target key end

     0   :  { %12 = vsyncpa [#allocation3], 0  ;;  %s732_s0 = inlined_call_operand.hbm [shape: f32[8,12], index: 0, kind: input, shape index: {}]   ;;  %s733_s1 = inlined_call_operand.hbm [shape: f32[12,128], index: 1, kind: input, shape index: {}]   ;;  %s734_s2 = inlined_call_operand.vmem [shape: f32[1,128], index: 2, kind: input, shape index: {}]   ;;  %s735_s3 = inlined_call_operand.hbm [shape: f32[128,128], index: 3, kind: input, shape index: {}]   ;;  %s736_s4 = inlined_call_operand.vmem [shape: f32[1,128], index: 4, kind: input, shape index: {}]   ;;  %s737_s5 = inlined_call_operand.hbm [shape: f32[128,128], index: 5, kind: input, shape index: {}]   ;;  %s738_s6 = inlined_call_operand.vmem [shape: f32[1,128], index: 6, kind: input, shape index: {}]   ;;  %s739_s7 = inlined_call_operand.hbm [shape: f32[8,128], index: 7, kind: output, shape index: {}]  }
   0x1   :  { %13 = vsyncpa [#allocation6], 0 }
   0x2   :  { %14 = vsyncpa [#allocation9], 0 }
   0x3   :  { %15 = vsyncpa [#allocation4], 0  ;;  %s610_s24 = smov [#allocation5]  }
   0x4   :  { %s31_s25 = sshll.u32 %s610_s24, 4  ;;  %s32_s25 = int_to_ptr.vmem [resolvable:$true] %s31_s25 }
   0x5   :  { %s510_s26 = scalar_lea.vmem %s32_s25, 256  ;;  %p515_p1 = scmp.lt.s32.totalorder %s32_s25, %s32_s25 }
   0x6   :  { %p511_p0 = scmp.ne.s32.totalorder %s32_s25, %s510_s26  ;;  %p516_p2 = scmp.lt.s32.totalorder %s510_s26, %s510_s26 }
   0x8   :  { %p517_p3 = por %p516_p2, %p515_p1 }
   0xa   :  { %p518_p4 = pnand %p517_p3, %p511_p0 }
   0xc   :  { %521 = shalt.err (!%p518_p4)
}
   0xd   :  { %s611_s27 = smov 128   ;;  %s612_s28 = smov 8  }
   0xe   :  { %37 = dma.hbm_to_vmem [thread:$0]  %s733_s1, 256, %s32_s25, [#allocation6], %s611_s27, %s611_s27, %s612_s28  }
   0xf   :  { %s613_s8 = smov [#allocation2]   ;;  %s614_s10 = smov [#allocation7]  }
  0x10   :  { %s22_s9 = sshll.u32 %s613_s8, 4  ;;  %s45_s11 = sshll.u32 %s614_s10, 4  ;;  %s23_s9 = int_to_ptr.vmem [resolvable:$true] %s22_s9  ;;  %s46_s11 = int_to_ptr.vmem [resolvable:$true] %s45_s11 }
  0x11   :  { %s530_s12 = scalar_lea.vmem %s23_s9, 128  ;;  %p535_p6 = scmp.lt.s32.totalorder %s23_s9, %s23_s9 }
  0x12   :  { %p531_p5 = scmp.ne.s32.totalorder %s23_s9, %s530_s12  ;;  %p536_p7 = scmp.lt.s32.totalorder %s530_s12, %s530_s12 }
  0x14   :  { %p537_p8 = por %p536_p7, %p535_p6 }
  0x16   :  { %p538_p9 = pnand %p537_p8, %p531_p5 }
  0x18   :  { %541 = shalt.err (!%p538_p9)
}
  0x19   :  { %25 = dma.hbm_to_vmem [thread:$0]  %s732_s0, 128, %s23_s9, [#allocation3]  }
  0x1a   :  { %s550_s15 = scalar_lea.vmem %s46_s11, 2048  ;;  %p555_p11 = scmp.lt.s32.totalorder %s46_s11, %s46_s11 }
  0x1b   :  { %p551_p10 = scmp.ne.s32.totalorder %s46_s11, %s550_s15  ;;  %p556_p12 = scmp.lt.s32.totalorder %s550_s15, %s550_s15 }
  0x1d   :  { %p557_p13 = por %p556_p12, %p555_p11 }
  0x1f   :  { %p558_p0 = pnand %p557_p13, %p551_p10 }
  0x21   :  { %561 = shalt.err (!%p558_p0)
}
  0x22   :  { %51 = dma.hbm_to_vmem [thread:$0]  %s735_s3, 2048, %s46_s11, [#allocation6], %s611_s27, %s611_s27, %s612_s28  }
  0x23   :  { %s615_s17 = smov [#allocation8]  }
  0x24   :  { %s59_s18 = sshll.u32 %s615_s17, 4  ;;  %s60_s18 = int_to_ptr.vmem [resolvable:$true] %s59_s18 }
  0x25   :  { %s570_s19 = scalar_lea.vmem %s60_s18, 2048  ;;  %p575_p2 = scmp.lt.s32.totalorder %s60_s18, %s60_s18 }
  0x26   :  { %p571_p1 = scmp.ne.s32.totalorder %s60_s18, %s570_s19  ;;  %p576_p3 = scmp.lt.s32.totalorder %s570_s19, %s570_s19 }
  0x28   :  { %p577_p4 = por %p576_p3, %p575_p2 }
  0x2a   :  { %p578_p5 = pnand %p577_p4, %p571_p1 }
  0x2c   :  { %581 = shalt.err (!%p578_p5)
}
  0x2d   :  { %65 = dma.hbm_to_vmem [thread:$0]  %s737_s5, 2048, %s60_s18, [#allocation9], %s611_s27, %s611_s27, %s612_s28  }
  0x2e   :  { %602 = dma.done.wait [#allocation3], 128  }
  0x2f   :  { %603 = vsyncadd [#allocation3], 4294967168 }
  0x30   :  { %604 = dma.done.wait [#allocation6], 2304  }
  0x31   :  { %605 = vsyncadd [#allocation6], 4294964992 }
  0x32   :  { %606 = dma.done.wait [#allocation9], 2048  }
  0x33   :  { %607 = vsyncadd [#allocation9], 4294965248  ;;  %v616_v0 = vmov 0.0   ;;  %vm617_vm0 = vmmov 0   ;;  %vm94_vm1 = vcmask 1043456   ;;  %v81_v2 = vld [vmem:[#allocation5] sm:$0xff] }
  0x34   :  { %416 = vmatprep.subr.mxu0 %v616_v0  ;;  %420 = vmatprep.mubr.msk.f32.mxu0 %vm617_vm0, %v616_v0  ;;  %v82_v1 = vld [vmem:[#allocation5 + $0x8] sm:$0xf]  ;;  %v80_v3 = vld [vmem:[#allocation2] sm:$0xff]  ;;  %vm90_vm2 = vcmask 97280   ;;  %v183_v5 = vld [vmem:[#allocation7 + $0x70] sm:$0xff]  ;;  %s618_s24 = smov [#allocation10]  }
  0x35   :  { %423 = vmatprep.subr.mxu1 %v616_v0  ;;  %455 = vmatprep.mubr.msk.f32.mxu1 %vm617_vm0, %v616_v0  ;;  %v184_v4 = vld [vmem:[#allocation7 + $0x78] sm:$0xff]  ;;  %v182_v6 = vld [vmem:[#allocation7 + $0x68] sm:$0xff]  ;;  %v181_v7 = vld [vmem:[#allocation7 + $0x60] sm:$0xff]  ;;  %s363_s25 = sshll.u32 %s618_s24, 4  ;;  %s364_s25 = int_to_ptr.vmem [resolvable:$true] %s363_s25 }
  0x36   :  { %417 = vmatpush3.msk.msra.mxu0 %vm94_vm1, %v82_v1  ;;  %424 = vmatpush3.msra.mxu1 %v184_v4  ;;  %v180_v8 = vld [vmem:[#allocation7 + $0x58] sm:$0xff]  ;;  %v179_v9 = vld [vmem:[#allocation7 + $0x50] sm:$0xff]  ;;  %v178_v10 = vld [vmem:[#allocation7 + $0x48] sm:$0xff]  ;;  %s582_s26 = scalar_lea.vmem %s364_s25, 128  ;;  %p587_p7 = scmp.lt.s32.totalorder %s364_s25, %s364_s25 }
  0x37   :  { %418 = vmatprep.subr.mxu0 %v616_v0  ;;  %425 = vmatprep.subr.mxu1 %v616_v0  ;;  %v177_v11 = vld [vmem:[#allocation7 + $0x40] sm:$0xff]  ;;  %v176_v12 = vld [vmem:[#allocation7 + $0x38] sm:$0xff]  ;;  %v175_v13 = vld [vmem:[#allocation7 + $0x30] sm:$0xff]  ;;  %p583_p6 = scmp.ne.s32.totalorder %s364_s25, %s582_s26  ;;  %p588_p8 = scmp.lt.s32.totalorder %s582_s26, %s582_s26 }
  0x38   :  { %419 = vmatpush3.msra.mxu0 %v81_v2  ;;  %426 = vmatpush3.msra.mxu1 %v183_v5  ;;  %v174_v14 = vld [vmem:[#allocation7 + $0x28] sm:$0xff]  ;;  %v173_v15 = vld [vmem:[#allocation7 + $0x20] sm:$0xff]  ;;  %v172_v16 = vld [vmem:[#allocation7 + $0x18] sm:$0xff] }
  0x39   :  { %421 = vmatmul.mubr.msk.f32.vlgmr.msra.gmra.mxu0 %vm90_vm2, %v80_v3  ;;  %427 = vmatprep.subr.mxu1 %v616_v0  ;;  %v171_v17 = vld [vmem:[#allocation7 + $0x10] sm:$0xff]  ;;  %v170_v18 = vld [vmem:[#allocation7 + $0x8] sm:$0xff]  ;;  %v169_v19 = vld [vmem:[#allocation7] sm:$0xff]  ;;  %p589_p9 = por %p588_p8, %p587_p7 }
  0x3a   :  { %458 = vmatprep.subr.mxu0 %v616_v0  ;;  %428 = vmatpush3.msra.mxu1 %v182_v6  ;;  %v278_v20 = vld [vmem:[#allocation8 + $0x78] sm:$0xff]  ;;  %v277_v21 = vld [vmem:[#allocation8 + $0x70] sm:$0xff]  ;;  %v276_v22 = vld [vmem:[#allocation8 + $0x68] sm:$0xff] }
  0x3b   :  { %490 = vmatprep.mubr.msk.f32.mxu0 %vm617_vm0, %v616_v0  ;;  %429 = vmatprep.subr.mxu1 %v616_v0  ;;  %v275_v23 = vld [vmem:[#allocation8 + $0x60] sm:$0xff]  ;;  %v274_v24 = vld [vmem:[#allocation8 + $0x58] sm:$0xff]  ;;  %v273_v25 = vld [vmem:[#allocation8 + $0x50] sm:$0xff]  ;;  %p590_p10 = pnand %p589_p9, %p583_p6 }
  0x3c   :  { %430 = vmatpush3.msra.mxu1 %v181_v7  ;;  %459 = vmatpush3.msra.mxu0 %v278_v20  ;;  %v272_v26 = vld [vmem:[#allocation8 + $0x48] sm:$0xff]  ;;  %v271_v27 = vld [vmem:[#allocation8 + $0x40] sm:$0xff]  ;;  %v270_v28 = vld [vmem:[#allocation8 + $0x38] sm:$0xff] }
  0x3d   :  { %431 = vmatprep.subr.mxu1 %v616_v0  ;;  %460 = vmatprep.subr.mxu0 %v616_v0  ;;  %v269_v29 = vld [vmem:[#allocation8 + $0x30] sm:$0xff]  ;;  %v268_v30 = vld [vmem:[#allocation8 + $0x28] sm:$0xff]  ;;  %v267_v31 = vld [vmem:[#allocation8 + $0x20] sm:$0xff] }
  0x3e   :  { %432 = vmatpush3.msra.mxu1 %v180_v8  ;;  %461 = vmatpush3.msra.mxu0 %v277_v21  ;;  %v266_v32 = vld [vmem:[#allocation8 + $0x18] sm:$0xff]  ;;  %v374_v33 = vld [vmem:[%s734_s2] ss:$0 sm:$0xff]  ;;  %v265_v38 = vld [vmem:[#allocation8 + $0x10] sm:$0xff] }
  0x3f   :  { %433 = vmatprep.subr.mxu1 %v616_v0  ;;  %462 = vmatprep.subr.mxu0 %v616_v0  ;;  %v264_v39 = vld [vmem:[#allocation8 + $0x8] sm:$0xff]  ;;  %v263_v40 = vld [vmem:[#allocation8] sm:$0xff] }
  0x40   :  { %434 = vmatpush3.msra.mxu1 %v179_v9  ;;  %463 = vmatpush3.msra.mxu0 %v276_v22  ;;  %v377_v41 = vld [vmem:[%s736_s4] ss:$0 sm:$0xff] }
  0x41   :  { %435 = vmatprep.subr.mxu1 %v616_v0  ;;  %464 = vmatprep.subr.mxu0 %v616_v0  ;;  %v378_v46 = vld [vmem:[%s738_s6] ss:$0 sm:$0xff] }
  0x42   :  { %436 = vmatpush3.msra.mxu1 %v178_v10  ;;  %465 = vmatpush3.msra.mxu0 %v275_v23 }
  0x43   :  { %437 = vmatprep.subr.mxu1 %v616_v0  ;;  %466 = vmatprep.subr.mxu0 %v616_v0 }
  0x44   :  { %438 = vmatpush3.msra.mxu1 %v177_v11  ;;  %467 = vmatpush3.msra.mxu0 %v274_v24 }
  0x45   :  { %439 = vmatprep.subr.mxu1 %v616_v0  ;;  %468 = vmatprep.subr.mxu0 %v616_v0 }
  0x46   :  { %440 = vmatpush3.msra.mxu1 %v176_v12  ;;  %469 = vmatpush3.msra.mxu0 %v273_v25 }
  0x47   :  { %441 = vmatprep.subr.mxu1 %v616_v0  ;;  %470 = vmatprep.subr.mxu0 %v616_v0 }
  0x48   :  { %442 = vmatpush3.msra.mxu1 %v175_v13  ;;  %471 = vmatpush3.msra.mxu0 %v272_v26 }
  0x49   :  { %443 = vmatprep.subr.mxu1 %v616_v0  ;;  %472 = vmatprep.subr.mxu0 %v616_v0 }
  0x4a   :  { %444 = vmatpush3.msra.mxu1 %v174_v14  ;;  %473 = vmatpush3.msra.mxu0 %v271_v27 }
  0x4b   :  { %445 = vmatprep.subr.mxu1 %v616_v0  ;;  %474 = vmatprep.subr.mxu0 %v616_v0 }
  0x4c   :  { %446 = vmatpush3.msra.mxu1 %v173_v15  ;;  %475 = vmatpush3.msra.mxu0 %v270_v28 }
  0x4d   :  { %447 = vmatprep.subr.mxu1 %v616_v0  ;;  %476 = vmatprep.subr.mxu0 %v616_v0 }
  0x4e   :  { %448 = vmatpush3.msra.mxu1 %v172_v16  ;;  %477 = vmatpush3.msra.mxu0 %v269_v29 }
  0x4f   :  { %449 = vmatprep.subr.mxu1 %v616_v0  ;;  %478 = vmatprep.subr.mxu0 %v616_v0 }
  0x50   :  { %450 = vmatpush3.msra.mxu1 %v171_v17  ;;  %479 = vmatpush3.msra.mxu0 %v268_v30 }
  0x51   :  { %451 = vmatprep.subr.mxu1 %v616_v0  ;;  %480 = vmatprep.subr.mxu0 %v616_v0 }
  0x52   :  { %452 = vmatpush3.msra.mxu1 %v170_v18  ;;  %481 = vmatpush3.msra.mxu0 %v267_v31 }
  0x53   :  { %453 = vmatprep.subr.mxu1 %v616_v0  ;;  %482 = vmatprep.subr.mxu0 %v616_v0 }
  0x54   :  { %454 = vmatpush3.msra.mxu1 %v169_v19  ;;  %483 = vmatpush3.msra.mxu0 %v266_v32 }
  0x55   :  { %484 = vmatprep.subr.mxu0 %v616_v0 }
  0x56   :  { %485 = vmatpush3.msra.mxu0 %v265_v38 }
  0x57   :  { %486 = vmatprep.subr.mxu0 %v616_v0 }
  0x58   :  { %487 = vmatpush3.msra.mxu0 %v264_v39 }
  0x59   :  { %488 = vmatprep.subr.mxu0 %v616_v0 }
  0x5a   :  { %489 = vmatpush3.msra.mxu0 %v263_v40 }
  0xf9   :  { %v164_v34 = vpop.f32.mrf.mxu0 }
  0xfa   :  { %v165_v35 = vadd.f32 %v374_v33, %v164_v34 }
  0xfb   :  { %v422_v36 = vpop.f32.mrf.mxu0 }
  0xfc   :  { %v168_v37 = vmax.f32 %v165_v35, 0.0 }
  0xfe   :  { %456 = vmatmul.mubr.f32.vlgmr.msra.gmra.mxu1 %v168_v37 }
 0x1be   :  { %v258_v42 = vpop.f32.mrf.mxu1 }
 0x1bf   :  { %v259_v43 = vadd.f32 %v377_v41, %v258_v42 }
 0x1c0   :  { %v457_v44 = vpop.f32.mrf.mxu1 }
 0x1c1   :  { %v262_v45 = vmax.f32 %v259_v43, 0.0 }
 0x1c3   :  { %491 = vmatmul.mubr.f32.vlgmr.msra.gmra.mxu0 %v262_v45 }
 0x283   :  { %v352_v47 = vpop.f32.mrf.mxu0 }
 0x284   :  { %v353_v48 = vadd.f32 %v378_v46, %v352_v47 }
 0x285   :  { %v492_v49 = vpop.f32.mrf.mxu0 }
 0x286   :  { %356 = vst [vmem:[#allocation10] sm:$0xff] %v353_v48 }
 0x287   :  { %593 = shalt.err (!%p590_p10)
}
 0x288   :  { %366 = dma.vmem_to_hbm [thread:$0]  %s364_s25, 128, %s739_s7, [#allocation4]  }
 0x289   :  { %608 = dma.done.wait [#allocation4], 128  }
 0x28a   :  { %609 = vsyncadd [#allocation4], 4294967168 }
 0x28b   :  { %370 = vsyncpa [#allocation3], 1 }
 0x28c   :  { %371 = vsyncpa [#allocation6], 1 }
 0x28d   :  { %372 = vsyncpa [#allocation9], 1 }
 0x28e   :  { %373 = vsyncpa [#allocation4], 1 }

</bundles_post_ra>
